<compile_context>
chip_gen: v7x
topology: tpu7x:2x2x1
jax: 0.10.0
libtpu: 0.0.40
codegen_flags: <defaults>
</compile_context>

<pallas_src>
import math
import functools

import numpy as np
import jax
import jax.numpy as jnp
from jax.experimental import pallas as pl
from jax.experimental.pallas import tpu as pltpu


def timestep_embedding_kernel(t_ref, f_ref, o_ref, *, half_dim, store_split):
    t = t_ref[...]                    # (TB, 1)        f32
    freq = f_ref[...]                 # (1, half_dim)  f32 (host-computed const)
    arg = t * freq                    # (TB, half_dim) VPU broadcast-mul
    if store_split:
        # two unmasked, 128-lane-aligned stores; no lane-axis concat/relayout
        o_ref[:, :half_dim] = jnp.sin(arg)
        o_ref[:, half_dim:] = jnp.cos(arg)
    else:
        o_ref[...] = jnp.concatenate([jnp.sin(arg), jnp.cos(arg)], axis=-1)


def timestep_embedding(timesteps, ch, *, tile_rows=512):
    """timesteps: (B,) float/int array -> (B, 2*(ch//2)) float32 embedding."""
    B = timesteps.shape[0]
    half_dim = ch // 2
    assert half_dim >= 2, "ch must be >= 4 (half_dim - 1 appears in a divisor)"
    out_dim = 2 * half_dim            # == ch for even ch (matches torch.cat width)

    # Host-side frequency table (trace-time constant; no in-kernel exp).
    neg_log_scale = -math.log(10000.0) / (half_dim - 1)
    freq = jnp.asarray(
        np.exp(np.arange(half_dim, dtype=np.float64) * neg_log_scale),
        dtype=jnp.float32,
    ).reshape(1, half_dim)

    t2d = timesteps.astype(jnp.float32).reshape(B, 1)
    store_split = (half_dim % 128 == 0)
    kernel = functools.partial(
        timestep_embedding_kernel, half_dim=half_dim, store_split=store_split
    )

    if B <= tile_rows:
        # Tiny batch: single grid-less call, whole problem resident in VMEM.
        return pl.pallas_call(
            kernel,
            out_shape=jax.ShapeDtypeStruct((B, out_dim), jnp.float32),
            in_specs=[
                pl.BlockSpec(memory_space=pltpu.MemorySpace.VMEM),
                pl.BlockSpec(memory_space=pltpu.MemorySpace.VMEM),
            ],
            out_specs=pl.BlockSpec(memory_space=pltpu.MemorySpace.VMEM),
        )(t2d, freq)

    # Large batch: 1-D row grid, "parallel" semantics (shards across TCs on
    # v7x).  Row tile is a multiple of 8; pad B up to a whole number of tiles.
    TB = max(8, (tile_rows // 8) * 8)
    nblocks = pl.cdiv(B, TB)
    Bp = nblocks * TB
    if Bp != B:
        t2d = jnp.pad(t2d, ((0, Bp - B), (0, 0)))

    out = pl.pallas_call(
        kernel,
        out_shape=jax.ShapeDtypeStruct((Bp, out_dim), jnp.float32),
        grid=(nblocks,),
        in_specs=[
            pl.BlockSpec((TB, 1), lambda i: (i, 0)),
            pl.BlockSpec((1, half_dim), lambda i: (0, 0)),
        ],
        out_specs=pl.BlockSpec((TB, out_dim), lambda i: (i, 0)),
        compiler_params=pltpu.CompilerParams(
            dimension_semantics=("parallel",)
        ),
    )(t2d, freq)
    return out[:B]


def reference_forward(timesteps, ch):
    """Pure-JAX reference mirroring the PyTorch forward."""
    half_dim = ch // 2
    emb = math.log(10000.0) / (half_dim - 1)
    emb = jnp.exp(jnp.arange(half_dim, dtype=jnp.float32) * -emb)
    emb = timesteps.astype(jnp.float32)[:, None] * emb[None, :]
    return jnp.concatenate([jnp.sin(emb), jnp.cos(emb)], axis=1)


if __name__ == "__main__":
    CH = 256  # half_dim = 128 -> each sin/cos half is exactly one lane-width

    key = jax.random.PRNGKey(0)
    k1, k2 = jax.random.split(key)

    # 1) tiny-batch (grid-less) path
    B_small = 8
    ts_small = jax.random.randint(k1, (B_small,), 0, 1000).astype(jnp.float32)
    out_small = jax.block_until_ready(timestep_embedding(ts_small, CH))
    ref_small = jax.block_until_ready(reference_forward(ts_small, CH))
    assert out_small.shape == (B_small, CH)
    assert jnp.allclose(out_small, ref_small, rtol=1e-3, atol=1e-3), float(
        jnp.max(jnp.abs(out_small - ref_small))
    )

    # 2) row-grid (parallel) path, exercised at a small scale via tile_rows=8
    B_big = 32
    ts_big = jax.random.randint(k2, (B_big,), 0, 1000).astype(jnp.float32)
    out_big = jax.block_until_ready(
        timestep_embedding(ts_big, CH, tile_rows=8)
    )
    ref_big = jax.block_until_ready(reference_forward(ts_big, CH))
    assert out_big.shape == (B_big, CH)
    assert jnp.allclose(out_big, ref_big, rtol=1e-3, atol=1e-3), float(
        jnp.max(jnp.abs(out_big - ref_big))
    )

    print("KERNEL_OK")
</pallas_src>

<mosaic_0001>
module attributes {stable_mosaic.version = 11 : i64} {
  func.func @timestep_embedding_kernel(%arg0: memref<8x1xf32, #tpu.memory_space<vmem>>, %arg1: memref<1x128xf32, #tpu.memory_space<vmem>>, %arg2: memref<8x256xf32, #tpu.memory_space<vmem>>) attributes {dimension_semantics = [], scalar_prefetch = 0 : i64, scratch_operands = 0 : i64, tpu.core_type = #tpu.core_type<tc>} {
    %c0 = arith.constant 0 : index
    %c0_0 = arith.constant 0 : index
    %0 = vector.load %arg0[%c0, %c0_0] : memref<8x1xf32, #tpu.memory_space<vmem>>, vector<8x1xf32>
    %c0_1 = arith.constant 0 : index
    %c0_2 = arith.constant 0 : index
    %1 = vector.load %arg1[%c0_1, %c0_2] : memref<1x128xf32, #tpu.memory_space<vmem>>, vector<1x128xf32>
    %2 = vector.broadcast %0 : vector<8x1xf32> to vector<8x128xf32>
    %3 = vector.broadcast %1 : vector<1x128xf32> to vector<8x128xf32>
    %4 = arith.mulf %2, %3 : vector<8x128xf32>
    %5 = math.sin %4 : vector<8x128xf32>
    %c0_3 = arith.constant 0 : index
    %c0_4 = arith.constant 0 : index
    %6 = vector.load %arg2[%c0_3, %c0_4] : memref<8x256xf32, #tpu.memory_space<vmem>>, vector<8x128xf32>
    tpu.vector_store %arg2[%c0_3, %c0_4], %5 {strides = array<i32>} : memref<8x256xf32, #tpu.memory_space<vmem>>, vector<8x128xf32>,
    %7 = math.cos %4 : vector<8x128xf32>
    %c0_5 = arith.constant 0 : index
    %c128 = arith.constant 128 : index
    %8 = vector.load %arg2[%c0_5, %c128] : memref<8x256xf32, #tpu.memory_space<vmem>>, vector<8x128xf32>
    tpu.vector_store %arg2[%c0_5, %c128], %7 {strides = array<i32>} : memref<8x256xf32, #tpu.memory_space<vmem>>, vector<8x128xf32>,
    return
  }
}

</mosaic_0001>

<bundles_post_ra>
// kernel: tpu_custom_call.1
= control target key start
LH: loop header
LB: loop body
LE: loop exit
PB: predicated region body
PF: predicated region fallthrough
CT: control target
= control target key end

     0   :  { %v299_v1 = vmov 0   ;;  %s361_s0 = inlined_call_operand.vmem [shape: f32[8,1], index: 0, kind: input, shape index: {}]   ;;  %s362_s1 = inlined_call_operand.vmem [shape: f32[1,128], index: 1, kind: input, shape index: {}]   ;;  %s363_s2 = inlined_call_operand.hbm [shape: f32[8,256], index: 2, kind: output, shape index: {}]  }
   0x1   :  { %v12_v0 = vld [vmem:[%s361_s0] sm:$0xff]  ;;  %270 = vset.pattern.permute.xlu0 %v299_v1 }
   0x2   :  { %16 = vperm.xlu0 %270, %v12_v0  }
   0x3   :  { %7 = vsyncpa [#allocation3], 0  ;;  %v249_v2 = vld [vmem:[%s362_s1] ss:$0 sm:$0xff]  ;;  %v300_v15 = vmov 683565275  }
   0x4   :  { %v301_v17 = vmov 2475754826   ;;  %v302_v20 = vmov 2131351028   ;;  %v303_v23 = vmov 2102212464  }
   0x5   :  { %v304_v26 = vmov 920167782   ;;  %v305_v29 = vmov 1326507024   ;;  %s306_s0 = smov [#allocation2]  }
   0x6   :  { %s241_s1 = sshll.u32 %s306_s0, 4  ;;  %s242_s1 = int_to_ptr.vmem [resolvable:$true] %s241_s1 }
   0x7   :  { %s275_s13 = scalar_lea.vmem %s242_s1, 256  ;;  %p280_p1 = scmp.lt.s32.totalorder %s242_s1, %s242_s1 }
   0x8   :  { %p276_p0 = scmp.ne.s32.totalorder %s242_s1, %s275_s13  ;;  %p281_p2 = scmp.lt.s32.totalorder %s275_s13, %s275_s13 }
   0xa   :  { %p282_p3 = por %p281_p2, %p280_p1 }
   0xc   :  { %p283_p4 = pnand %p282_p3, %p276_p0 }
  0x81   :  { %v17_v3 = vpop.permute.xlu0 %16 }
  0x82   :  { %v328_v4 = vmul.f32 %v249_v2, %v17_v3 }
  0x84   :  { %v29_v5 = vand.u32 2139095040, %v328_v4  ;;  %v26_v9 = vand.u32 2147483647, %v328_v4  ;;  %vm28_vm7 = vcmp.lt.s32.totalorder %v328_v4, 0  ;;  %vm118_vm15 = vweird.f32 %v328_v4 }
  0x86   :  { %v30_v6 = vshrl.u32 %v29_v5, 23  ;;  %v33_v12 = vand.u32 8388607, %v26_v9  ;;  %vm27_vm8 = vcmp.le.f32.partialorder %v26_v9, 0.7853982 }
  0x88   :  { %v250_v7 = vadd.s32 4294967169, %v30_v6  ;;  %v34_v31 = vor.u32 8388608, %v33_v12 }
  0x8a   :  { %v36_v8 = vadd.s32 1, %v250_v7  ;;  %v74_v45 = vshll.u32 %v34_v31, 8 }
  0x8c   :  { %vm37_vm0 = vcmp.gt.s32.totalorder %v36_v8, 0 }
  0x8d   :  { %v38_v10 = vsel %vm37_vm0, %v36_v8, 0 }
  0x8e   :  { %v40_v11 = vand.u32 31, %v38_v10  ;;  %v39_v14 = vshrl.u32 %v38_v10, 5 }
  0x90   :  { %v41_v13 = vsub.s32 32, %v40_v11  ;;  %v43_v16 = vshll.u32 %v300_v15, %v40_v11  ;;  %v46_v18 = vshll.u32 %v301_v17, %v40_v11  ;;  %v49_v22 = vshll.u32 %v302_v20, %v40_v11 }
  0x91   :  { %v52_v25 = vshll.u32 %v303_v23, %v40_v11  ;;  %v55_v28 = vshll.u32 %v304_v26, %v40_v11  ;;  %vm58_vm1 = vcmp.lt.s32.totalorder %v39_v14, 1  ;;  %vm61_vm2 = vcmp.lt.s32.totalorder %v39_v14, 4 }
  0x92   :  { %v44_v19 = vshrl.u32 %v301_v17, %v41_v13  ;;  %v47_v21 = vshrl.u32 %v302_v20, %v41_v13  ;;  %v50_v24 = vshrl.u32 %v303_v23, %v41_v13  ;;  %v53_v27 = vshrl.u32 %v304_v26, %v41_v13 }
  0x93   :  { %v56_v30 = vshrl.u32 %v305_v29, %v41_v13  ;;  %v42_v40 = vshrl.u32 %v300_v15, %v41_v13  ;;  %vm60_vm3 = vcmp.lt.s32.totalorder %v39_v14, 3  ;;  %vm59_vm4 = vcmp.lt.s32.totalorder %v39_v14, 2 }
  0x94   :  { %v45_v32 = vor.u32 %v44_v19, %v43_v16  ;;  %v48_v33 = vor.u32 %v47_v21, %v46_v18  ;;  %v51_v34 = vor.u32 %v50_v24, %v49_v22  ;;  %v54_v35 = vor.u32 %v53_v27, %v52_v25 }
  0x95   :  { %v57_v36 = vor.u32 %v56_v30, %v55_v28 }
  0x96   :  { %v63_v37 = vsel %vm61_vm2, %v51_v34, 2102212464  ;;  %v66_v38 = vsel %vm58_vm1, %v45_v32, %v48_v33  ;;  %v70_v39 = vsel %vm58_vm1, %v48_v33, %v51_v34  ;;  %v67_v41 = vsel %vm61_vm2, %v54_v35, 920167782 }
  0x97   :  { %v71_v42 = vsel %vm61_vm2, %v57_v36, 1326507024  ;;  %v68_v43 = vsel %vm60_vm3, %v51_v34, %v67_v41  ;;  %v62_v46 = vsel %vm58_vm1, %v42_v40, %v45_v32  ;;  %v64_v47 = vsel %vm60_vm3, %v48_v33, %v63_v37 }
  0x98   :  { %v72_v44 = vsel %vm60_vm3, %v54_v35, %v71_v42  ;;  %v69_v48 = vsel %vm59_vm4, %v66_v38, %v68_v43  ;;  %v65_v54 = vsel %vm59_vm4, %v62_v46, %v64_v47 }
  0x99   :  { %v73_v49 = vsel %vm59_vm4, %v70_v39, %v72_v44  ;;  %v337_v52 = vmul.u32.u64.low %v74_v45, %v69_v48  ;;  %v338_v53 = vmul.u32.u64.high %v74_v45, %v69_v48, %v337_v52  ;;  %v81_v56 = vmul.u32 %v74_v45, %v65_v54 }
  0x9a   :  { %v334_v50 = vmul.u32.u64.low %v74_v45, %v73_v49  ;;  %v335_v51 = vmul.u32.u64.high %v74_v45, %v73_v49, %v334_v50 }
  0x9b   :  { %v84_v55 = vadd.s32 1, %v338_v53 }
  0x9c   :  { %vm83_vm5 = vc.u32 %v335_v51, %v337_v52  ;;  %v82_v5 = vadd.s32 %v337_v52, %v335_v51 }
  0x9d   :  { %v85_v57 = vsel %vm83_vm5, %v84_v55, %v338_v53 }
  0x9e   :  { %v86_v58 = vadd.s32 %v85_v57, %v81_v56 }
  0xa0   :  { %v87_v59 = vadd.s32 536870912, %v86_v58 }
  0xa2   :  { %v88_v60 = vshrl.u32 %v87_v59, 30 }
  0xa4   :  { %v89_v61 = vshll.u32 %v88_v60, 30  ;;  %v112_v18 = vsub.s32 4, %v88_v60 }
  0xa6   :  { %v90_v62 = vsub.s32 %v86_v58, %v89_v61  ;;  %v113_v21 = vsel %vm28_vm7, %v112_v18, %v88_v60 }
  0xa7   :  { %v115_v23 = vsel %vm27_vm8, 0, %v113_v21 }
  0xa8   :  { %v92_v63 = vsub.s32 0, %v90_v62  ;;  %v119_v24 = vadd.s32 3, %v115_v23  ;;  %v224_v26 = vand.u32 3, %v115_v23 }
  0xaa   :  { %v251_v0 = vmin.u32 %v92_v63, %v90_v62  ;;  %v120_v25 = vand.u32 3, %v119_v24  ;;  %vm229_vm10 = vcmp.eq.s32.totalorder %v224_v26, 2  ;;  %vm226_vm12 = vcmp.eq.s32.totalorder %v224_v26, 0 }
  0xab   :  { %vm225_vm14 = vcmp.lt.s32.totalorder %v224_v26, 2 }
  0xac   :  { %v94_v1 = vclz %v251_v0  ;;  %vm125_vm9 = vcmp.eq.s32.totalorder %v120_v25, 2  ;;  %vm122_vm11 = vcmp.eq.s32.totalorder %v120_v25, 0  ;;  %vm121_vm13 = vcmp.lt.s32.totalorder %v120_v25, 2 }
  0xae   :  { %v252_v2 = vadd.s32 4294967294, %v94_v1 }
  0xb0   :  { %vm253_vm6 = vcmp.lt.s32.totalorder %v252_v2, 0 }
  0xb1   :  { %v97_v3 = vsel %vm253_vm6, 0, %v252_v2 }
  0xb2   :  { %v98_v6 = vsub.s32 32, %v97_v3  ;;  %v102_v7 = vsub.s32 4294967266, %v97_v3  ;;  %v99_v8 = vshll.u32 %v90_v62, %v97_v3 }
  0xb4   :  { %v100_v10 = vshrl.u32 %v82_v5, %v98_v6  ;;  %v103_v11 = vadd.s32 127, %v102_v7 }
  0xb6   :  { %v101_v12 = vor.u32 %v100_v10, %v99_v8  ;;  %v104_v13 = vshll.u32 %v103_v11, 23 }
  0xb8   :  { %v105_v14 = vor.u32 4788187, %v104_v13  ;;  %v108_v16 = vcvt.s32.f32 %v101_v12 }
  0xba   :  { %v106_v15 = vand.u32 2147483647, %v105_v14 }
  0xbc   :  { %v109_v17 = vmul.f32 %v108_v16, %v106_v15 }
  0xbe   :  { %v110_v19 = vxor.u32 2147483648, %v109_v17 }
  0xc0   :  { %v111_v20 = vsel %vm28_vm7, %v110_v19, %v109_v17 }
  0xc1   :  { %v114_v22 = vsel %vm27_vm8, %v328_v4, %v111_v20 }
  0xc2   :  { %271 = vcosq.f32 %v114_v22 }
  0xc3   :  { %273 = vsinq.f32 %v114_v22 }
  0xcc   :  { %v272_v27 = vpop.eup %271 }
  0xcd   :  { %v274_v28 = vpop.eup %273  ;;  %v126_v29 = vxor.u32 2147483648, %v272_v27 }
  0xce   :  { %v123_v30 = vxor.u32 2147483648, %v274_v28 }
  0xcf   :  { %v127_v9 = vsel %vm125_vm9, %v126_v29, %v274_v28  ;;  %v231_v31 = vsel %vm229_vm10, %v126_v29, %v274_v28 }
  0xd0   :  { %v124_v32 = vsel %vm122_vm11, %v272_v27, %v123_v30  ;;  %v228_v33 = vsel %vm226_vm12, %v272_v27, %v123_v30 }
  0xd1   :  { %v128_v34 = vsel %vm121_vm13, %v124_v32, %v127_v9  ;;  %v232_v35 = vsel %vm225_vm14, %v228_v33, %v231_v31 }
  0xd2   :  { %v129_v36 = vsel %vm118_vm15, nan, %v128_v34  ;;  %v233_v37 = vsel %vm118_vm15, nan, %v232_v35 }
  0xd3   :  { %130 = vst [vmem:[#allocation2] sm:$0xff] %v129_v36  ;;  %234 = vst [vmem:[#allocation2 + $0x8] sm:$0xff] %v233_v37 }
  0xd4   :  { %286 = shalt.err (!%p283_p4)
}
  0xd5   :  { %s287_s16 = scalar_lea.hbm %s363_s2, 256 }
  0xd6   :  { %p288_p5 = scmp.ne.s32.totalorder %s363_s2, %s287_s16  ;;  %p291_p6 = scmp.lt.u32.totalorder %s287_s16, %s363_s2 }
  0xd8   :  { %p293_p7 = pnand %p291_p6, %p288_p5 }
  0xda   :  { %296 = shalt.err (!%p293_p7)
}
  0xdb   :  { %244 = dma.vmem_to_hbm [thread:$0]  %s242_s1, 256, %s363_s2, [#allocation3]  }
  0xdc   :  { %297 = dma.done.wait [#allocation3], 256  }
  0xdd   :  { %298 = vsyncadd [#allocation3], 4294967040 }
  0xde   :  { %248 = vsyncpa [#allocation3], 1 }

</bundles_post_ra>
